<compile_context>
chip_gen: v5e
topology: v5e:2x2
jax: 0.10.0
libtpu: 0.0.40
codegen_flags: <defaults>
</compile_context>

<pallas_src>
import jax
import jax.numpy as jnp
from jax.experimental import pallas as pl
from jax.experimental.pallas import tpu as pltpu


def qry_tower_kernel(x_ref, w_ref, b_ref, o_ref):
    # x_ref: (TB, F) native-dtype VMEM  -- streamed batch tile
    # w_ref: (1, F)  f32 VMEM           -- resident weight row (OUT == 1)
    # b_ref: (1,)    f32 SMEM           -- bias scalar
    # o_ref: (1, TB) f32 VMEM           -- lane-dense output row
    x = x_ref[...].astype(jnp.float32)          # in-kernel upcast (bf16-safe)
    w = w_ref[...]                              # (1, F) sublane-broadcast
    s = jnp.sum(x * w, axis=-1) + b_ref[0]      # VPU mul + XLU lane reduce -> (TB,)
    o_ref[...] = s[None, :]                     # relayout to lane-dense (1, TB) store


def qry_tower_forward(x, weight, bias, *, max_batch_tile=8192):
    """x: [B, F], weight: [1, F] f32, bias: [1] f32 -> [B, 1] f32.

    Matches torch.nn.Linear: y = x @ W^T + b.
    """
    B, F = x.shape
    OUT = weight.shape[0]
    assert OUT == 1, "QryTower has a single output unit"

    w_row = weight.reshape(1, F).astype(jnp.float32)
    b_smem = bias.reshape(1).astype(jnp.float32)

    # Batch tile: whole array if it fits one tile, else a multiple-of-128
    # streaming tile (keeps both the (TB, F) input block and the lane-dense
    # (1, TB) output block legal; remainder tiles are masked by Pallas).
    if B <= max_batch_tile:
        TB = B
    else:
        TB = max(128, (max_batch_tile // 128) * 128)
    grid = (pl.cdiv(B, TB),)

    itemsize = jnp.dtype(x.dtype).itemsize
    cost = pl.CostEstimate(
        flops=2 * B * F,
        transcendentals=0,
        bytes_accessed=B * F * itemsize + B * 4 + F * 4 + 4,
    )

    y_row = pl.pallas_call(
        qry_tower_kernel,
        out_shape=jax.ShapeDtypeStruct((1, B), jnp.float32),
        grid=grid,
        in_specs=[
            pl.BlockSpec((TB, F), lambda i: (i, 0)),             # streamed batch tile
            pl.BlockSpec((1, F), lambda i: (0, 0)),              # resident weight row
            pl.BlockSpec(memory_space=pltpu.MemorySpace.SMEM),   # bias scalar in SMEM
        ],
        out_specs=pl.BlockSpec((1, TB), lambda i: (0, i)),       # lane-dense output
        compiler_params=pltpu.CompilerParams(
            dimension_semantics=("parallel",),
        ),
        cost_estimate=cost,
    )(x, w_row, b_smem)                                          # x in native dtype

    return y_row.reshape(B, OUT)


if __name__ == "__main__":
    key = jax.random.PRNGKey(0)
    k_x, k_w, k_b, k_x2 = jax.random.split(key, 4)

    F, OUT = 10, 1  # Linear(10, 1)

    # Mimic PyTorch's uniform(-1/sqrt(F), 1/sqrt(F)) init range.
    bound = 1.0 / (F ** 0.5)
    weight = jax.random.uniform(k_w, (OUT, F), jnp.float32, -bound, bound)
    bias = jax.random.uniform(k_b, (OUT,), jnp.float32, -bound, bound)

    # Test 1: small batch, single full tile.
    B1 = 8
    x1 = jax.random.normal(k_x, (B1, F), jnp.float32)
    y1 = qry_tower_forward(x1, weight, bias)
    jax.block_until_ready(y1)
    y1_ref = x1 @ weight.T + bias
    assert y1.shape == (B1, OUT)
    assert jnp.allclose(y1, y1_ref, atol=1e-5, rtol=1e-5)

    # Test 2: B > tile and B % TB != 0 -> exercises the masked remainder tile.
    B2 = 300
    x2 = jax.random.normal(k_x2, (B2, F), jnp.float32)
    y2 = qry_tower_forward(x2, weight, bias, max_batch_tile=256)
    jax.block_until_ready(y2)
    y2_ref = x2 @ weight.T + bias
    assert y2.shape == (B2, OUT)
    assert jnp.allclose(y2, y2_ref, atol=1e-5, rtol=1e-5)

    print("KERNEL_OK")
</pallas_src>

<mosaic_0001>
module attributes {stable_mosaic.version = 11 : i64} {
  func.func @qry_tower_kernel(%arg0: i32, %arg1: memref<8x10xf32, #tpu.memory_space<vmem>>, %arg2: memref<1x10xf32, #tpu.memory_space<vmem>>, %arg3: memref<1xf32, #tpu.memory_space<smem>>, %arg4: memref<1x8xf32, #tpu.memory_space<vmem>>) attributes {dimension_semantics = [#tpu.dimension_semantics<parallel>], iteration_bounds = array<i64: 1>, scalar_prefetch = 0 : i64, scratch_operands = 0 : i64, tpu.core_type = #tpu.core_type<tc>, window_params = [{transform_indices = @transform_0, window_bounds = array<i64: 8, 10>}, {pipeline_mode = #tpu.pipeline_mode<synchronous>, transform_indices = @transform_1, window_bounds = array<i64: 1, 10>}, {transform_indices = @transform_2, window_bounds = array<i64: 1>}, {transform_indices = @transform_3, window_bounds = array<i64: 1, 8>}]} {
    %c0 = arith.constant 0 : index
    %c0_0 = arith.constant 0 : index
    %0 = vector.load %arg1[%c0, %c0_0] : memref<8x10xf32, #tpu.memory_space<vmem>>, vector<8x10xf32>
    %c0_1 = arith.constant 0 : index
    %c0_2 = arith.constant 0 : index
    %1 = vector.load %arg2[%c0_1, %c0_2] : memref<1x10xf32, #tpu.memory_space<vmem>>, vector<1x10xf32>
    %2 = vector.broadcast %1 : vector<1x10xf32> to vector<8x10xf32>
    %3 = arith.mulf %0, %2 : vector<8x10xf32>
    %cst = arith.constant dense<0.000000e+00> : vector<8xf32>
    %4 = vector.multi_reduction <add>, %3, %cst [1] : vector<8x10xf32> to vector<8xf32>
    %c0_3 = arith.constant 0 : index
    %5 = memref.load %arg3[%c0_3] : memref<1xf32, #tpu.memory_space<smem>>
    %6 = vector.broadcast %5 : f32 to vector<8xf32>
    %7 = arith.addf %4, %6 : vector<8xf32>
    %8 = vector.shape_cast %7 : vector<8xf32> to vector<1x8xf32>
    %c0_4 = arith.constant 0 : index
    %c0_5 = arith.constant 0 : index
    %9 = vector.load %arg4[%c0_4, %c0_5] : memref<1x8xf32, #tpu.memory_space<vmem>>, vector<1x8xf32>
    tpu.vector_store %arg4[%c0_4, %c0_5], %8 {strides = array<i32>} : memref<1x8xf32, #tpu.memory_space<vmem>>, vector<1x8xf32>,
    return
  }
  func.func @transform_0(%arg0: i32) -> (i32, i32) {
    %c0_i32 = arith.constant 0 : i32
    %c0_i32_0 = arith.constant 0 : i32
    return %arg0, %c0_i32 : i32, i32
  }
  func.func @transform_1(%arg0: i32) -> (i32, i32) {
    %c0_i32 = arith.constant 0 : i32
    %c0_i32_0 = arith.constant 0 : i32
    %c0_i32_1 = arith.constant 0 : i32
    return %c0_i32, %c0_i32_0 : i32, i32
  }
  func.func @transform_2(%arg0: i32) -> i32 {
    %c0_i32 = arith.constant 0 : i32
    %c0_i32_0 = arith.constant 0 : i32
    return %c0_i32 : i32
  }
  func.func @transform_3(%arg0: i32) -> (i32, i32) {
    %c0_i32 = arith.constant 0 : i32
    %c0_i32_0 = arith.constant 0 : i32
    return %c0_i32, %arg0 : i32, i32
  }
}

</mosaic_0001>

<bundles_post_ra>
// kernel: tpu_custom_call.1
= control target key start
LH: loop header
LB: loop body
LE: loop exit
PB: predicated region body
PF: predicated region fallthrough
CT: control target
= control target key end

     0   :  { %9 = vsyncpa [#allocation4], 0  ;;  %s156_s0 = inlined_call_operand.hbm [shape: f32[8,10], index: 0, kind: input, shape index: {}]   ;;  %s157_s1 = inlined_call_operand.vmem [shape: f32[1,10], index: 1, kind: input, shape index: {}]   ;;  %s158_s2 = inlined_call_operand.<no memory space> [shape: f32[1], index: 2, kind: input, shape index: {}]   ;;  %s159_s3 = inlined_call_operand.hbm [shape: f32[1,8], index: 3, kind: output, shape index: {}]  }
   0x1   :  { %10 = vsyncpa [#allocation5], 0  ;;  %s16_s14 = sshll.u32 %s156_s0, 4  ;;  %s122_s15 = smov [#allocation3]   ;;  %s17_s14 = int_to_ptr.hbm [resolvable:$true] %s16_s14 }
   0x2   :  { %s18_s16 = sshll.u32 %s122_s15, 4  ;;  %s19_s16 = int_to_ptr.vmem [resolvable:$true] %s18_s16 }
   0x3   :  { %21 = dma.hbm_to_vmem [thread:$0]  %s17_s14, 128, %s19_s16, [#allocation4]  }
   0x4   :  { %118 = dma.done.wait [#allocation4], 128  }
   0x5   :  { %119 = vsyncadd [#allocation4], 4294967168  ;;  %v30_v0 = vld [vmem:[#allocation3] sm:$0xff]  ;;  %vm36_vm0 = vcmask 80896   ;;  %v44_v4 = vlaneseq  ;;  %v41_v5 = vstv %s158_s2  ;;  %s123_s0 = smov [#allocation6]   ;;  %s57_s24 = sshll.u32 %s159_s3, 4  ;;  %s58_s24 = int_to_ptr.hbm [resolvable:$true] %s57_s24 }
   0x6   :  { %v69_v1 = vld [vmem:[%s157_s1] ss:$0 sm:$0xff]  ;;  %s55_s21 = sshll.u32 %s123_s0, 4  ;;  %vm48_vm1 = vcmask 57344   ;;  %s56_s21 = int_to_ptr.vmem [resolvable:$true] %s55_s21 }
   0x7   :  { %v35_v2 = vmul.f32 %v69_v1, %v30_v0  ;;  %v45_v6 = vand.u32 127, %v44_v4 }
   0x9   :  { %v37_v3 = vsel %vm36_vm0, %v35_v2, 0.0 }
   0xa   :  { %38 = vadd.xlane.f32.xlu0 %v37_v3 }
  0x7d   :  { %v39_v7 = vpop.xlane.xlu0 %38 }
  0x7e   :  { %v42_v8 = vadd.f32 %v41_v5, %v39_v7 }
  0x80   :  { %v46_v9 = vperm.slane %v42_v8, %v45_v6 }
  0x82   :  { %49 = vst.msk [vmem:[#allocation6] sm:$0x1] %vm48_vm1, %v46_v9 }
  0x83   :  { %60 = dma.vmem_to_hbm [thread:$0]  %s56_s21, 16, %s58_s24, [#allocation5]  }
  0x84   :  { %120 = dma.done.wait [#allocation5], 16  }
  0x85   :  { %121 = vsyncadd [#allocation5], 4294967280 }
  0x86   :  { %65 = vsyncpa [#allocation4], 1 }
  0x87   :  { %66 = vsyncpa [#allocation5], 1 }

</bundles_post_ra>
